<compile_context>
chip_gen: v7x
topology: tpu7x:2x2x1
jax: 0.10.0
libtpu: 0.0.40
codegen_flags: <defaults>
</compile_context>

<pallas_src>
import math

import jax
import jax.numpy as jnp
from jax.experimental import pallas as pl
from jax.experimental.pallas import tpu as pltpu

_SUBLANES = 8           # f32 sublane count
_DEFAULT_TILE_B = 1024  # per-step batch tile (review: 512-1024 ~85% HBM roofline)
_MEGACORE_SPLIT = 512   # above this batch size, always use >=2 grid steps (v7x)


def _round_up(x, m):
    return (x + m - 1) // m * m


def _nbytes(a):
    return math.prod(a.shape) * jnp.dtype(a.dtype).itemsize


def _choose_tiling(batch, tile_b):
    """Returns (tile_b, n_tiles). Keeps padding <= one sublane group per tile
    and guarantees >=2 grid steps for large batches (v7x megacore)."""
    b8 = _round_up(batch, _SUBLANES)
    if b8 <= min(tile_b, _MEGACORE_SPLIT):
        return b8, 1                     # whole-batch single tile for small B
    n_tiles = max(pl.cdiv(b8, tile_b), 2)
    tb = _round_up(pl.cdiv(b8, n_tiles), _SUBLANES)
    n_tiles = pl.cdiv(b8, tb)
    return tb, n_tiles


# ---------------------------------------------------------------------------
# Kernels
# ---------------------------------------------------------------------------
def _layer(h, w_ref, b_ref):
    """h @ W + b with f32 MXU accumulation (weights may be bf16 or f32)."""
    w = w_ref[...]
    acc = jnp.dot(h.astype(w.dtype), w, preferred_element_type=jnp.float32)
    return acc + b_ref[...].astype(jnp.float32)


def _mlp_tanh(x_ref, w1_ref, b1_ref, w2_ref, b2_ref, w3_ref, b3_ref,
              w4_ref, b4_ref):
    h = x_ref[...].astype(jnp.float32)
    h = jnp.maximum(_layer(h, w1_ref, b1_ref), 0.0)
    h = jnp.maximum(_layer(h, w2_ref, b2_ref), 0.0)
    h = jnp.maximum(_layer(h, w3_ref, b3_ref), 0.0)
    return jnp.tanh(_layer(h, w4_ref, b4_ref))


def _actor_fwd_kernel(x_ref, w1_ref, b1_ref, w2_ref, b2_ref, w3_ref, b3_ref,
                      w4_ref, b4_ref, o_ref):
    o_ref[...] = _mlp_tanh(x_ref, w1_ref, b1_ref, w2_ref, b2_ref,
                           w3_ref, b3_ref, w4_ref, b4_ref).astype(o_ref.dtype)


def _actor_get_action_kernel(std_ref, x_ref, w1_ref, b1_ref, w2_ref, b2_ref,
                             w3_ref, b3_ref, w4_ref, b4_ref, noise_ref, o_ref):
    action = _mlp_tanh(x_ref, w1_ref, b1_ref, w2_ref, b2_ref,
                       w3_ref, b3_ref, w4_ref, b4_ref)
    noise = jnp.clip(noise_ref[...].astype(jnp.float32) * std_ref[0], -0.5, 0.5)
    o_ref[...] = jnp.clip(action + noise, -1.0, 1.0).astype(o_ref.dtype)


# ---------------------------------------------------------------------------
# Wrappers
# ---------------------------------------------------------------------------
def _actor_pallas_call(kernel, state, params, *, tile_b,
                       pre_ops=(), pre_specs=(), post_ops=(), post_specs=(),
                       extra_bytes=0):
    B, state_dim = state.shape
    mid_dim = params["w1"].shape[1]
    action_dim = params["w4"].shape[1]

    tb, n_tiles = _choose_tiling(B, tile_b)
    b_pad = tb * n_tiles

    x = state
    if b_pad != B:
        x = jnp.pad(x, ((0, b_pad - B), (0, 0)))

    weights = (params["w1"], params["b1"], params["w2"], params["b2"],
               params["w3"], params["b3"], params["w4"], params["b4"])
    # Constant index_map -> weights stay VMEM-resident across batch tiles.
    weight_specs = [pl.BlockSpec(w.shape, lambda i: (0, 0)) for w in weights]

    x_spec = pl.BlockSpec((tb, state_dim), lambda i: (i, 0))
    # Unpadded, lane-small output block: last dim == full array dim is legal,
    # avoids 8-32x inflated HBM writeback and the extra XLA column-slice kernel.
    out_spec = pl.BlockSpec((tb, action_dim), lambda i: (i, 0))
    out_shape = jax.ShapeDtypeStruct((b_pad, action_dim), jnp.float32)

    flops = 2 * b_pad * (state_dim * mid_dim + 2 * mid_dim * mid_dim
                         + mid_dim * action_dim)
    w_bytes = sum(_nbytes(w) for w in weights)
    bytes_accessed = _nbytes(x) + w_bytes + b_pad * action_dim * 4 + extra_bytes
    cost = pl.CostEstimate(flops=int(flops),
                           transcendentals=int(b_pad * action_dim),
                           bytes_accessed=int(bytes_accessed))

    # Rough per-step VMEM footprint: double-buffered streamed tiles + resident
    # weights + live hidden activations. Cap at 48 MiB (v7x has 64 MiB VMEM).
    itemsize = jnp.dtype(state.dtype).itemsize
    vmem_est = (2 * tb * state_dim * itemsize      # x tile, double-buffered
                + 2 * 2 * tb * action_dim * 4      # out (+ noise) tiles
                + 2 * w_bytes                      # weights (default 2-deep)
                + 2 * tb * mid_dim * 4)            # live hidden activations
    vmem_limit = int(min(48 << 20, max(2 * vmem_est + (4 << 20), 16 << 20)))

    out = pl.pallas_call(
        kernel,
        out_shape=out_shape,
        grid=(n_tiles,),
        in_specs=[*pre_specs, x_spec, *weight_specs, *post_specs],
        out_specs=out_spec,
        compiler_params=pltpu.CompilerParams(
            # Batch tiles are independent -> shard across v7x's two
            # TensorCores; harmless no-op on single-TC v5e/v6e.
            dimension_semantics=("parallel",),
            vmem_limit_bytes=vmem_limit),
        cost_estimate=cost,
    )(*pre_ops, x, *weights, *post_ops)

    return out[:B] if b_pad != B else out


def actor_forward(state, params, *, tile_b=_DEFAULT_TILE_B):
    """Pallas-backed Actor.forward(state) -> tanh(MLP(state))."""
    return _actor_pallas_call(_actor_fwd_kernel, state, params, tile_b=tile_b)


def actor_get_action(state, params, action_std, key, *, tile_b=_DEFAULT_TILE_B):
    """Pallas-backed Actor.get_action:
       clip(tanh(MLP(x)) + clip(N(0,1)*std, -0.5, 0.5), -1, 1).
       Noise is drawn with jax.random (reproducible, independent of tiling);
       scale/clamp/add are fused into the forward kernel."""
    B = state.shape[0]
    action_dim = params["w4"].shape[1]
    tb, n_tiles = _choose_tiling(B, tile_b)
    b_pad = tb * n_tiles

    noise = jax.random.normal(key, (B, action_dim), jnp.float32)
    if b_pad != B:
        noise = jnp.pad(noise, ((0, b_pad - B), (0, 0)))

    std_arr = jnp.asarray([action_std], dtype=jnp.float32)
    smem = pl.BlockSpec(memory_space=pltpu.MemorySpace.SMEM)
    noise_spec = pl.BlockSpec((tb, action_dim), lambda i: (i, 0))

    return _actor_pallas_call(
        _actor_get_action_kernel, state, params, tile_b=tile_b,
        pre_ops=(std_arr,), pre_specs=(smem,),
        post_ops=(noise,), post_specs=(noise_spec,),
        extra_bytes=_nbytes(noise))


# ---------------------------------------------------------------------------
# Params + pure-JAX reference
# ---------------------------------------------------------------------------
def init_actor_params(key, mid_dim, state_dim, action_dim,
                      param_dtype=jnp.float32):
    """PyTorch-style init: U(-1/sqrt(fan_in), 1/sqrt(fan_in)). Weights stored
    [in, out] (transposed vs torch) so activations stay [batch, feat].
    param_dtype=jnp.bfloat16 halves weight DMA/VMEM and feeds the MXU natively
    (f32 accumulation is kept), but hidden activations then round to bf16."""
    dims = [(state_dim, mid_dim), (mid_dim, mid_dim),
            (mid_dim, mid_dim), (mid_dim, action_dim)]
    params = {}
    for i, (fan_in, fan_out) in enumerate(dims, start=1):
        key, kw, kb = jax.random.split(key, 3)
        bound = 1.0 / float(fan_in) ** 0.5
        params[f"w{i}"] = jax.random.uniform(
            kw, (fan_in, fan_out), jnp.float32, -bound, bound).astype(param_dtype)
        params[f"b{i}"] = jax.random.uniform(
            kb, (1, fan_out), jnp.float32, -bound, bound)
    return params


def actor_forward_ref(state, params):
    h = state
    for i in (1, 2, 3):
        h = jnp.maximum(
            h @ params[f"w{i}"].astype(jnp.float32) + params[f"b{i}"], 0.0)
    return jnp.tanh(h @ params["w4"].astype(jnp.float32) + params["b4"])


def actor_get_action_ref(state, params, action_std, key):
    action = actor_forward_ref(state, params)
    noise = jax.random.normal(key, action.shape, jnp.float32) * action_std
    noise = jnp.clip(noise, -0.5, 0.5)
    return jnp.clip(action + noise, -1.0, 1.0)


if __name__ == "__main__":
    key = jax.random.PRNGKey(0)
    k_params, k_state, k_noise = jax.random.split(key, 3)

    batch, state_dim, mid_dim, action_dim = 64, 16, 32, 4
    params = init_actor_params(k_params, mid_dim, state_dim, action_dim)
    state = jax.random.normal(k_state, (batch, state_dim), jnp.float32)

    # forward
    out = jax.block_until_ready(actor_forward(state, params))
    ref = actor_forward_ref(state, params)
    assert out.shape == (batch, action_dim)
    assert jnp.allclose(out, ref, atol=1e-5, rtol=1e-5), "forward mismatch"

    # ragged batch (exercises sublane/batch padding path)
    out10 = jax.block_until_ready(actor_forward(state[:10], params))
    assert jnp.allclose(out10, ref[:10], atol=1e-5, rtol=1e-5), "ragged mismatch"

    # fused get_action with std=0 must reduce exactly to the forward pass
    act0 = jax.block_until_ready(
        actor_get_action(state, params, 0.0, k_noise))
    assert jnp.allclose(act0, out, atol=1e-6, rtol=1e-6), "std=0 mismatch"

    # fused get_action with noise: exact match vs pure-JAX reference
    act = jax.block_until_ready(
        actor_get_action(state, params, 0.2, k_noise))
    act_ref = actor_get_action_ref(state, params, 0.2, k_noise)
    assert act.shape == (batch, action_dim)
    assert jnp.allclose(act, act_ref, atol=1e-5, rtol=1e-5), "noisy mismatch"
    assert bool(jnp.all(jnp.abs(act) <= 1.0 + 1e-6))

    print("KERNEL_OK")
</pallas_src>

<mosaic_0001>
module attributes {stable_mosaic.version = 11 : i64} {
  func.func @_actor_fwd_kernel(%arg0: i32, %arg1: memref<64x16xf32, #tpu.memory_space<vmem>>, %arg2: memref<16x32xf32, #tpu.memory_space<vmem>>, %arg3: memref<1x32xf32, #tpu.memory_space<vmem>>, %arg4: memref<32x32xf32, #tpu.memory_space<vmem>>, %arg5: memref<1x32xf32, #tpu.memory_space<vmem>>, %arg6: memref<32x32xf32, #tpu.memory_space<vmem>>, %arg7: memref<1x32xf32, #tpu.memory_space<vmem>>, %arg8: memref<32x4xf32, #tpu.memory_space<vmem>>, %arg9: memref<1x4xf32, #tpu.memory_space<vmem>>, %arg10: memref<64x4xf32, #tpu.memory_space<vmem>>) attributes {dimension_semantics = [#tpu.dimension_semantics<parallel>], iteration_bounds = array<i64: 1>, scalar_prefetch = 0 : i64, scratch_operands = 0 : i64, tpu.core_type = #tpu.core_type<tc>, window_params = [{transform_indices = @transform_0, window_bounds = array<i64: 64, 16>}, {pipeline_mode = #tpu.pipeline_mode<synchronous>, transform_indices = @transform_1, window_bounds = array<i64: 16, 32>}, {pipeline_mode = #tpu.pipeline_mode<synchronous>, transform_indices = @transform_2, window_bounds = array<i64: 1, 32>}, {pipeline_mode = #tpu.pipeline_mode<synchronous>, transform_indices = @transform_3, window_bounds = array<i64: 32, 32>}, {pipeline_mode = #tpu.pipeline_mode<synchronous>, transform_indices = @transform_4, window_bounds = array<i64: 1, 32>}, {pipeline_mode = #tpu.pipeline_mode<synchronous>, transform_indices = @transform_5, window_bounds = array<i64: 32, 32>}, {pipeline_mode = #tpu.pipeline_mode<synchronous>, transform_indices = @transform_6, window_bounds = array<i64: 1, 32>}, {pipeline_mode = #tpu.pipeline_mode<synchronous>, transform_indices = @transform_7, window_bounds = array<i64: 32, 4>}, {pipeline_mode = #tpu.pipeline_mode<synchronous>, transform_indices = @transform_8, window_bounds = array<i64: 1, 4>}, {transform_indices = @transform_9, window_bounds = array<i64: 64, 4>}]} {
    %c0 = arith.constant 0 : index
    %c0_0 = arith.constant 0 : index
    %0 = vector.load %arg1[%c0, %c0_0] : memref<64x16xf32, #tpu.memory_space<vmem>>, vector<64x16xf32>
    %c0_1 = arith.constant 0 : index
    %c0_2 = arith.constant 0 : index
    %1 = vector.load %arg2[%c0_1, %c0_2] : memref<16x32xf32, #tpu.memory_space<vmem>>, vector<16x32xf32>
    %cst = arith.constant dense<0.000000e+00> : vector<64x32xf32>
    %2 = tpu.matmul %0, %1, %cst {dimension_numbers = #tpu.dot_dimension_numbers<[1], [0], [0], [1], [0, 0, 1, 1], [], []>} : vector<64x16xf32>, vector<16x32xf32>, vector<64x32xf32> -> vector<64x32xf32>
    %c0_3 = arith.constant 0 : index
    %c0_4 = arith.constant 0 : index
    %3 = vector.load %arg3[%c0_3, %c0_4] : memref<1x32xf32, #tpu.memory_space<vmem>>, vector<1x32xf32>
    %4 = vector.broadcast %3 : vector<1x32xf32> to vector<64x32xf32>
    %5 = arith.addf %2, %4 : vector<64x32xf32>
    %cst_5 = arith.constant 0.000000e+00 : f32
    %6 = vector.broadcast %cst_5 : f32 to vector<64x32xf32>
    %7 = arith.maximumf %5, %6 : vector<64x32xf32>
    %c0_6 = arith.constant 0 : index
    %c0_7 = arith.constant 0 : index
    %8 = vector.load %arg4[%c0_6, %c0_7] : memref<32x32xf32, #tpu.memory_space<vmem>>, vector<32x32xf32>
    %cst_8 = arith.constant dense<0.000000e+00> : vector<64x32xf32>
    %9 = tpu.matmul %7, %8, %cst_8 {dimension_numbers = #tpu.dot_dimension_numbers<[1], [0], [0], [1], [0, 0, 1, 1], [], []>} : vector<64x32xf32>, vector<32x32xf32>, vector<64x32xf32> -> vector<64x32xf32>
    %c0_9 = arith.constant 0 : index
    %c0_10 = arith.constant 0 : index
    %10 = vector.load %arg5[%c0_9, %c0_10] : memref<1x32xf32, #tpu.memory_space<vmem>>, vector<1x32xf32>
    %11 = vector.broadcast %10 : vector<1x32xf32> to vector<64x32xf32>
    %12 = arith.addf %9, %11 : vector<64x32xf32>
    %cst_11 = arith.constant 0.000000e+00 : f32
    %13 = vector.broadcast %cst_11 : f32 to vector<64x32xf32>
    %14 = arith.maximumf %12, %13 : vector<64x32xf32>
    %c0_12 = arith.constant 0 : index
    %c0_13 = arith.constant 0 : index
    %15 = vector.load %arg6[%c0_12, %c0_13] : memref<32x32xf32, #tpu.memory_space<vmem>>, vector<32x32xf32>
    %cst_14 = arith.constant dense<0.000000e+00> : vector<64x32xf32>
    %16 = tpu.matmul %14, %15, %cst_14 {dimension_numbers = #tpu.dot_dimension_numbers<[1], [0], [0], [1], [0, 0, 1, 1], [], []>} : vector<64x32xf32>, vector<32x32xf32>, vector<64x32xf32> -> vector<64x32xf32>
    %c0_15 = arith.constant 0 : index
    %c0_16 = arith.constant 0 : index
    %17 = vector.load %arg7[%c0_15, %c0_16] : memref<1x32xf32, #tpu.memory_space<vmem>>, vector<1x32xf32>
    %18 = vector.broadcast %17 : vector<1x32xf32> to vector<64x32xf32>
    %19 = arith.addf %16, %18 : vector<64x32xf32>
    %cst_17 = arith.constant 0.000000e+00 : f32
    %20 = vector.broadcast %cst_17 : f32 to vector<64x32xf32>
    %21 = arith.maximumf %19, %20 : vector<64x32xf32>
    %c0_18 = arith.constant 0 : index
    %c0_19 = arith.constant 0 : index
    %22 = vector.load %arg8[%c0_18, %c0_19] : memref<32x4xf32, #tpu.memory_space<vmem>>, vector<32x4xf32>
    %cst_20 = arith.constant dense<0.000000e+00> : vector<64x4xf32>
    %23 = tpu.matmul %21, %22, %cst_20 {dimension_numbers = #tpu.dot_dimension_numbers<[1], [0], [0], [1], [0, 0, 1, 1], [], []>} : vector<64x32xf32>, vector<32x4xf32>, vector<64x4xf32> -> vector<64x4xf32>
    %c0_21 = arith.constant 0 : index
    %c0_22 = arith.constant 0 : index
    %24 = vector.load %arg9[%c0_21, %c0_22] : memref<1x4xf32, #tpu.memory_space<vmem>>, vector<1x4xf32>
    %25 = vector.broadcast %24 : vector<1x4xf32> to vector<64x4xf32>
    %26 = arith.addf %23, %25 : vector<64x4xf32>
    %27 = math.tanh %26 : vector<64x4xf32>
    %c0_23 = arith.constant 0 : index
    %c0_24 = arith.constant 0 : index
    %28 = vector.load %arg10[%c0_23, %c0_24] : memref<64x4xf32, #tpu.memory_space<vmem>>, vector<64x4xf32>
    tpu.vector_store %arg10[%c0_23, %c0_24], %27 {strides = array<i32>} : memref<64x4xf32, #tpu.memory_space<vmem>>, vector<64x4xf32>,
    return
  }
  func.func @transform_0(%arg0: i32) -> (i32, i32) {
    %c0_i32 = arith.constant 0 : i32
    %c0_i32_0 = arith.constant 0 : i32
    return %arg0, %c0_i32 : i32, i32
  }
  func.func @transform_1(%arg0: i32) -> (i32, i32) {
    %c0_i32 = arith.constant 0 : i32
    %c0_i32_0 = arith.constant 0 : i32
    %c0_i32_1 = arith.constant 0 : i32
    return %c0_i32, %c0_i32_0 : i32, i32
  }
  func.func @transform_2(%arg0: i32) -> (i32, i32) {
    %c0_i32 = arith.constant 0 : i32
    %c0_i32_0 = arith.constant 0 : i32
    %c0_i32_1 = arith.constant 0 : i32
    return %c0_i32, %c0_i32_0 : i32, i32
  }
  func.func @transform_3(%arg0: i32) -> (i32, i32) {
    %c0_i32 = arith.constant 0 : i32
    %c0_i32_0 = arith.constant 0 : i32
    %c0_i32_1 = arith.constant 0 : i32
    return %c0_i32, %c0_i32_0 : i32, i32
  }
  func.func @transform_4(%arg0: i32) -> (i32, i32) {
    %c0_i32 = arith.constant 0 : i32
    %c0_i32_0 = arith.constant 0 : i32
    %c0_i32_1 = arith.constant 0 : i32
    return %c0_i32, %c0_i32_0 : i32, i32
  }
  func.func @transform_5(%arg0: i32) -> (i32, i32) {
    %c0_i32 = arith.constant 0 : i32
    %c0_i32_0 = arith.constant 0 : i32
    %c0_i32_1 = arith.constant 0 : i32
    return %c0_i32, %c0_i32_0 : i32, i32
  }
  func.func @transform_6(%arg0: i32) -> (i32, i32) {
    %c0_i32 = arith.constant 0 : i32
    %c0_i32_0 = arith.constant 0 : i32
    %c0_i32_1 = arith.constant 0 : i32
    return %c0_i32, %c0_i32_0 : i32, i32
  }
  func.func @transform_7(%arg0: i32) -> (i32, i32) {
    %c0_i32 = arith.constant 0 : i32
    %c0_i32_0 = arith.constant 0 : i32
    %c0_i32_1 = arith.constant 0 : i32
    return %c0_i32, %c0_i32_0 : i32, i32
  }
  func.func @transform_8(%arg0: i32) -> (i32, i32) {
    %c0_i32 = arith.constant 0 : i32
    %c0_i32_0 = arith.constant 0 : i32
    %c0_i32_1 = arith.constant 0 : i32
    return %c0_i32, %c0_i32_0 : i32, i32
  }
  func.func @transform_9(%arg0: i32) -> (i32, i32) {
    %c0_i32 = arith.constant 0 : i32
    %c0_i32_0 = arith.constant 0 : i32
    return %arg0, %c0_i32 : i32, i32
  }
}

</mosaic_0001>

<bundles_post_ra>
// kernel: tpu_custom_call.1
= control target key start
LH: loop header
LB: loop body
LE: loop exit
PB: predicated region body
PF: predicated region fallthrough
CT: control target
= control target key end

     0   :  { %vm49_vm0 = vcmask 130048   ;;  %vm198_vm1 = vcmask 261120   ;;  %vm632_vm2 = vcmask 31744   ;;  %s1039_s1 = inlined_call_operand.vmem [shape: f32[16,32], index: 1, kind: input, shape index: {}]   ;;  %s1040_s0 = inlined_call_operand.vmem [shape: f32[64,16], index: 0, kind: input, shape index: {}]   ;;  %s1041_s3 = inlined_call_operand.vmem [shape: f32[32,32], index: 3, kind: input, shape index: {}]   ;;  %s1042_s5 = inlined_call_operand.vmem [shape: f32[32,32], index: 5, kind: input, shape index: {}]   ;;  %s1043_s2 = inlined_call_operand.vmem [shape: f32[1,32], index: 2, kind: input, shape index: {}]   ;;  %s1044_s7 = inlined_call_operand.vmem [shape: f32[32,4], index: 7, kind: input, shape index: {}]   ;;  %s1045_s4 = inlined_call_operand.vmem [shape: f32[1,32], index: 4, kind: input, shape index: {}]   ;;  %s1046_s6 = inlined_call_operand.vmem [shape: f32[1,32], index: 6, kind: input, shape index: {}]   ;;  %s1047_s8 = inlined_call_operand.vmem [shape: f32[1,4], index: 8, kind: input, shape index: {}]   ;;  %s1048_s9 = inlined_call_operand.vmem [shape: f32[64,4], index: 9, kind: output, shape index: {}]  }
   0x1   :  { %v40_v0 = vld [vmem:[%s1039_s1] sm:$0xff]  ;;  %v41_v1 = vld [vmem:[%s1039_s1 + $0x8] sm:$0xff]  ;;  %v34_v8 = vld [vmem:[%s1040_s0 + $0x10] sm:$0xff] }
   0x2   :  { %v32_v2 = vld [vmem:[%s1040_s0] sm:$0xff]  ;;  %v803_v3 = vpack.c.bf16 %v41_v1, %v40_v0  ;;  %v188_v5 = vld [vmem:[%s1041_s3 + $0x8] sm:$0xff]  ;;  %v35_v9 = vld [vmem:[%s1040_s0 + $0x18] sm:$0xff] }
   0x3   :  { %731 = vmatprep.mubr.msk.f32.mxu0 %vm49_vm0, %v32_v2  ;;  %v187_v4 = vld [vmem:[%s1041_s3] sm:$0xff]  ;;  %v33_v6 = vld [vmem:[%s1040_s0 + $0x8] sm:$0xff]  ;;  %v38_v12 = vld [vmem:[%s1040_s0 + $0x30] sm:$0xff] }
   0x4   :  { %804 = vmatprep.subr.bf16.mxu0 %v803_v3  ;;  %v807_v7 = vpack.c.bf16 %v188_v5, %v187_v4  ;;  %v36_v10 = vld [vmem:[%s1040_s0 + $0x20] sm:$0xff]  ;;  %v37_v11 = vld [vmem:[%s1040_s0 + $0x28] sm:$0xff]  ;;  %v39_v13 = vld [vmem:[%s1040_s0 + $0x38] sm:$0xff] }
   0x5   :  { %806 = vmatpush3.bf16.msra.mxu0 %v803_v3  ;;  %v189_v14 = vld [vmem:[%s1041_s3 + $0x10] sm:$0xff]  ;;  %v190_v15 = vld [vmem:[%s1041_s3 + $0x18] sm:$0xff]  ;;  %v336_v17 = vld [vmem:[%s1042_s5] sm:$0xff] }
   0x6   :  { %808 = vmatprep.subr.bf16.mxu1 %v807_v7  ;;  %v811_v16 = vpack.c.bf16 %v190_v15, %v189_v14  ;;  %v337_v18 = vld [vmem:[%s1042_s5 + $0x8] sm:$0xff]  ;;  %v338_v19 = vld [vmem:[%s1042_s5 + $0x10] sm:$0xff]  ;;  %v339_v21 = vld [vmem:[%s1042_s5 + $0x18] sm:$0xff] }
   0x7   :  { %810 = vmatpush3.bf16.msra.mxu1 %v807_v7  ;;  %v815_v20 = vpack.c.bf16 %v337_v18, %v336_v17  ;;  %v819_v22 = vpack.c.bf16 %v339_v21, %v338_v19  ;;  %v645_v23 = vld [vmem:[%s1043_s2] ss:$0 sm:$0xff]  ;;  %v485_v49 = vld [vmem:[%s1044_s7 + $0x8] sm:$0xff]  ;;  %v486_v50 = vld [vmem:[%s1044_s7 + $0x10] sm:$0xff] }
   0x8   :  { %732 = vmatmul.mubr.msk.f32.vlgmr.msra.gmra.mrb[0].mxu0 %vm49_vm0, %v33_v6  ;;  %812 = vmatprep.subr.bf16.mxu1 %v811_v16  ;;  %v484_v48 = vld [vmem:[%s1044_s7] sm:$0xff]  ;;  %v487_v52 = vld [vmem:[%s1044_s7 + $0x18] sm:$0xff] }
   0x9   :  { %734 = vmatprep.mubr.msk.f32.mxu0 %vm49_vm0, %v34_v8  ;;  %816 = vmatprep.subr.bf16.mxu0 %v815_v20  ;;  %v823_v51 = vpack.c.bf16 %v485_v49, %v484_v48  ;;  %v827_v53 = vpack.c.bf16 %v487_v52, %v486_v50  ;;  %v654_v54 = vld [vmem:[%s1045_s4] ss:$0 sm:$0xff] }
   0xa   :  { %818 = vmatpush3.bf16.msra.mxu0 %v815_v20  ;;  %v663_v15 = vld [vmem:[%s1046_s6] ss:$0 sm:$0xff] }
   0xb   :  { %814 = vmatpush3.bf16.msra.mxu1 %v811_v16  ;;  %820 = vmatprep.subr.bf16.mxu0 %v819_v22 }
   0xc   :  { %735 = vmatmul.mubr.msk.f32.gmra.mrb[2].mxu0 %vm49_vm0, %v35_v9  ;;  %824 = vmatprep.subr.bf16.mxu1 %v823_v51 }
   0xd   :  { %737 = vmatprep.mubr.msk.f32.mxu0 %vm49_vm0, %v36_v10 }
   0xe   :  { %822 = vmatpush3.bf16.msra.mxu0 %v819_v22 }
  0x10   :  { %738 = vmatmul.mubr.msk.f32.gmra.mrb[4].mxu0 %vm49_vm0, %v37_v11 }
  0x11   :  { %740 = vmatprep.mubr.msk.f32.mxu0 %vm49_vm0, %v38_v12 }
  0x14   :  { %741 = vmatmul.mubr.msk.f32.gmra.mrb[6].mxu0 %vm49_vm0, %v39_v13 }
  0xdb   :  { %v733_v24 = vpop.f32.mrb[0].mxu0 }
  0xdc   :  { %v146_v25 = vadd.f32 %v733_v24, %v645_v23  ;;  %v140_v26 = vpop.f32.mrb[1].mxu0 }
  0xdd   :  { %v141_v27 = vadd.f32 %v645_v23, %v140_v26 }
  0xde   :  { %v180_v30 = vmax.f32 %v146_v25, 0.0 }
  0xdf   :  { %v179_v28 = vmax.f32 %v141_v27, 0.0  ;;  %v736_v29 = vpop.f32.mrb[2].mxu0 }
  0xe0   :  { %v156_v31 = vadd.f32 %v736_v29, %v645_v23  ;;  %v150_v32 = vpop.f32.mrb[3].mxu0 }
  0xe1   :  { %v151_v33 = vadd.f32 %v645_v23, %v150_v32  ;;  %751 = vmatprep.mubr.msk.f32.mxu1 %vm198_vm1, %v179_v28 }
  0xe2   :  { %752 = vmatmul.mubr.msk.f32.vlgmr.msra.gmra.mrb[0].mxu1 %vm198_vm1, %v180_v30  ;;  %v182_v36 = vmax.f32 %v156_v31, 0.0 }
  0xe3   :  { %v181_v34 = vmax.f32 %v151_v33, 0.0  ;;  %v739_v35 = vpop.f32.mrb[4].mxu0  ;;  %826 = vmatpush3.bf16.msra.mxu1 %v823_v51 }
  0xe4   :  { %v166_v37 = vadd.f32 %v739_v35, %v645_v23  ;;  %v160_v38 = vpop.f32.mrb[5].mxu0  ;;  %828 = vmatprep.subr.bf16.mxu1 %v827_v53 }
  0xe5   :  { %v161_v39 = vadd.f32 %v645_v23, %v160_v38  ;;  %754 = vmatprep.mubr.msk.f32.mxu1 %vm198_vm1, %v181_v34 }
  0xe6   :  { %755 = vmatmul.mubr.msk.f32.gmra.mrb[2].mxu1 %vm198_vm1, %v182_v36  ;;  %v184_v42 = vmax.f32 %v166_v37, 0.0 }
  0xe7   :  { %v183_v40 = vmax.f32 %v161_v39, 0.0  ;;  %v742_v41 = vpop.f32.mrb[6].mxu0  ;;  %830 = vmatpush3.bf16.msra.mxu1 %v827_v53 }
  0xe8   :  { %v176_v43 = vadd.f32 %v742_v41, %v645_v23  ;;  %v170_v44 = vpop.f32.mrb[7].mxu0 }
  0xe9   :  { %v171_v45 = vadd.f32 %v645_v23, %v170_v44  ;;  %757 = vmatprep.mubr.msk.f32.mxu1 %vm198_vm1, %v183_v40  ;;  %v672_v40 = vld [vmem:[%s1047_s8] ss:$0 sm:$0xff] }
  0xea   :  { %758 = vmatmul.mubr.msk.f32.gmra.mrb[4].mxu1 %vm198_vm1, %v184_v42  ;;  %v186_v47 = vmax.f32 %v176_v43, 0.0 }
  0xeb   :  { %v185_v46 = vmax.f32 %v171_v45, 0.0 }
  0xed   :  { %760 = vmatprep.mubr.msk.f32.mxu1 %vm198_vm1, %v185_v46 }
  0xee   :  { %761 = vmatmul.mubr.msk.f32.gmra.mrb[6].mxu1 %vm198_vm1, %v186_v47 }
 0x1b5   :  { %v753_v55 = vpop.f32.mrb[0].mxu1 }
 0x1b6   :  { %v295_v56 = vadd.f32 %v753_v55, %v654_v54  ;;  %v289_v57 = vpop.f32.mrb[1].mxu1 }
 0x1b7   :  { %v290_v58 = vadd.f32 %v654_v54, %v289_v57 }
 0x1b8   :  { %v329_v61 = vmax.f32 %v295_v56, 0.0 }
 0x1b9   :  { %v328_v59 = vmax.f32 %v290_v58, 0.0  ;;  %v756_v60 = vpop.f32.mrb[2].mxu1 }
 0x1ba   :  { %v305_v62 = vadd.f32 %v756_v60, %v654_v54  ;;  %v299_v63 = vpop.f32.mrb[3].mxu1 }
 0x1bb   :  { %v300_v0 = vadd.f32 %v654_v54, %v299_v63  ;;  %771 = vmatprep.mubr.msk.f32.mxu0 %vm198_vm1, %v328_v59 }
 0x1bc   :  { %772 = vmatmul.mubr.msk.f32.vlgmr.msra.gmra.mrb[8].mxu0 %vm198_vm1, %v329_v61  ;;  %v331_v3 = vmax.f32 %v305_v62, 0.0 }
 0x1bd   :  { %v330_v1 = vmax.f32 %v300_v0, 0.0  ;;  %v759_v2 = vpop.f32.mrb[4].mxu1 }
 0x1be   :  { %v315_v4 = vadd.f32 %v759_v2, %v654_v54  ;;  %v309_v5 = vpop.f32.mrb[5].mxu1 }
 0x1bf   :  { %v310_v6 = vadd.f32 %v654_v54, %v309_v5  ;;  %774 = vmatprep.mubr.msk.f32.mxu0 %vm198_vm1, %v330_v1 }
 0x1c0   :  { %775 = vmatmul.mubr.msk.f32.gmra.mrb[10].mxu0 %vm198_vm1, %v331_v3  ;;  %v333_v9 = vmax.f32 %v315_v4, 0.0 }
 0x1c1   :  { %v332_v7 = vmax.f32 %v310_v6, 0.0  ;;  %v762_v8 = vpop.f32.mrb[6].mxu1 }
 0x1c2   :  { %v325_v10 = vadd.f32 %v762_v8, %v654_v54  ;;  %v319_v11 = vpop.f32.mrb[7].mxu1 }
 0x1c3   :  { %v320_v12 = vadd.f32 %v654_v54, %v319_v11  ;;  %777 = vmatprep.mubr.msk.f32.mxu0 %vm198_vm1, %v332_v7 }
 0x1c4   :  { %778 = vmatmul.mubr.msk.f32.gmra.mrb[12].mxu0 %vm198_vm1, %v333_v9  ;;  %v335_v14 = vmax.f32 %v325_v10, 0.0 }
 0x1c5   :  { %v334_v13 = vmax.f32 %v320_v12, 0.0 }
 0x1c7   :  { %780 = vmatprep.mubr.msk.f32.mxu0 %vm198_vm1, %v334_v13 }
 0x1c8   :  { %781 = vmatmul.mubr.msk.f32.gmra.mrb[14].mxu0 %vm198_vm1, %v335_v14 }
 0x28f   :  { %v773_v16 = vpop.f32.mrb[8].mxu0 }
 0x290   :  { %v443_v17 = vadd.f32 %v773_v16, %v663_v15  ;;  %v437_v18 = vpop.f32.mrb[9].mxu0 }
 0x291   :  { %v438_v19 = vadd.f32 %v663_v15, %v437_v18 }
 0x292   :  { %v477_v22 = vmax.f32 %v443_v17, 0.0 }
 0x293   :  { %v476_v20 = vmax.f32 %v438_v19, 0.0  ;;  %v776_v21 = vpop.f32.mrb[10].mxu0 }
 0x294   :  { %v453_v23 = vadd.f32 %v776_v21, %v663_v15  ;;  %v447_v24 = vpop.f32.mrb[11].mxu0 }
 0x295   :  { %v448_v25 = vadd.f32 %v663_v15, %v447_v24  ;;  %791 = vmatprep.mubr.msk.f32.mxu1 %vm198_vm1, %v476_v20 }
 0x296   :  { %792 = vmatmul.mubr.msk.f32.vlgmr.msra.gmra.mrb[8].mxu1 %vm198_vm1, %v477_v22  ;;  %v479_v28 = vmax.f32 %v453_v23, 0.0 }
 0x297   :  { %v478_v26 = vmax.f32 %v448_v25, 0.0  ;;  %v779_v27 = vpop.f32.mrb[12].mxu0 }
 0x298   :  { %v463_v29 = vadd.f32 %v779_v27, %v663_v15  ;;  %v457_v30 = vpop.f32.mrb[13].mxu0 }
 0x299   :  { %v458_v31 = vadd.f32 %v663_v15, %v457_v30  ;;  %794 = vmatprep.mubr.msk.f32.mxu1 %vm198_vm1, %v478_v26 }
 0x29a   :  { %795 = vmatmul.mubr.msk.f32.gmra.mrb[10].mxu1 %vm198_vm1, %v479_v28  ;;  %v481_v34 = vmax.f32 %v463_v29, 0.0 }
 0x29b   :  { %v480_v32 = vmax.f32 %v458_v31, 0.0  ;;  %v782_v33 = vpop.f32.mrb[14].mxu0 }
 0x29c   :  { %v473_v35 = vadd.f32 %v782_v33, %v663_v15  ;;  %v467_v36 = vpop.f32.mrb[15].mxu0 }
 0x29d   :  { %v468_v37 = vadd.f32 %v663_v15, %v467_v36  ;;  %797 = vmatprep.mubr.msk.f32.mxu1 %vm198_vm1, %v480_v32 }
 0x29e   :  { %798 = vmatmul.mubr.msk.f32.gmra.mrb[12].mxu1 %vm198_vm1, %v481_v34  ;;  %v483_v39 = vmax.f32 %v473_v35, 0.0 }
 0x29f   :  { %v482_v38 = vmax.f32 %v468_v37, 0.0 }
 0x2a1   :  { %800 = vmatprep.mubr.msk.f32.mxu1 %vm198_vm1, %v482_v38 }
 0x2a2   :  { %801 = vmatmul.mubr.msk.f32.gmra.mrb[14].mxu1 %vm198_vm1, %v483_v39 }
 0x369   :  { %v793_v41 = vpop.f32.mrb[8].mxu1 }
 0x36a   :  { %v591_v42 = vadd.f32 %v793_v41, %v672_v40  ;;  %v585_v43 = vpop.f32.mrb[9].mxu1 }
 0x36b   :  { %v586_v44 = vadd.f32 %v672_v40, %v585_v43 }
 0x36c   :  { %831 = vtanh.f32 %v591_v42 }
 0x36d   :  { %833 = vtanh.f32 %v586_v44  ;;  %v796_v45 = vpop.f32.mrb[10].mxu1 }
 0x36e   :  { %v601_v46 = vadd.f32 %v796_v45, %v672_v40  ;;  %v595_v47 = vpop.f32.mrb[11].mxu1 }
 0x36f   :  { %v596_v48 = vadd.f32 %v672_v40, %v595_v47 }
 0x370   :  { %835 = vtanh.f32 %v601_v46 }
 0x371   :  { %837 = vtanh.f32 %v596_v48  ;;  %v799_v49 = vpop.f32.mrb[12].mxu1 }
 0x372   :  { %v611_v50 = vadd.f32 %v799_v49, %v672_v40  ;;  %v605_v51 = vpop.f32.mrb[13].mxu1 }
 0x373   :  { %v606_v52 = vadd.f32 %v672_v40, %v605_v51 }
 0x374   :  { %839 = vtanh.f32 %v611_v50 }
 0x375   :  { %841 = vtanh.f32 %v606_v52  ;;  %v802_v53 = vpop.f32.mrb[14].mxu1 }
 0x376   :  { %v832_v54 = vpop.eup %831  ;;  %v621_v55 = vadd.f32 %v802_v53, %v672_v40  ;;  %v615_v56 = vpop.f32.mrb[15].mxu1 }
 0x377   :  { %v834_v57 = vpop.eup %833  ;;  %634 = vst.msk [vmem:[%s1048_s9 + $0x8] sm:$0xff] %vm632_vm2, %v832_v54  ;;  %v616_v58 = vadd.f32 %v672_v40, %v615_v56 }
 0x378   :  { %633 = vst.msk [vmem:[%s1048_s9] sm:$0xff] %vm632_vm2, %v834_v57  ;;  %843 = vtanh.f32 %v621_v55 }
 0x379   :  { %845 = vtanh.f32 %v616_v58 }
 0x37a   :  { %v836_v59 = vpop.eup %835 }
 0x37b   :  { %v838_v60 = vpop.eup %837  ;;  %636 = vst.msk [vmem:[%s1048_s9 + $0x18] sm:$0xff] %vm632_vm2, %v836_v59 }
 0x37c   :  { %635 = vst.msk [vmem:[%s1048_s9 + $0x10] sm:$0xff] %vm632_vm2, %v838_v60 }
 0x37e   :  { %v840_v61 = vpop.eup %839 }
 0x37f   :  { %v842_v62 = vpop.eup %841  ;;  %638 = vst.msk [vmem:[%s1048_s9 + $0x28] sm:$0xff] %vm632_vm2, %v840_v61 }
 0x380   :  { %637 = vst.msk [vmem:[%s1048_s9 + $0x20] sm:$0xff] %vm632_vm2, %v842_v62 }
 0x382   :  { %v844_v63 = vpop.eup %843 }
 0x383   :  { %v846_v0 = vpop.eup %845  ;;  %640 = vst.msk [vmem:[%s1048_s9 + $0x38] sm:$0xff] %vm632_vm2, %v844_v63 }
 0x384   :  { %639 = vst.msk [vmem:[%s1048_s9 + $0x30] sm:$0xff] %vm632_vm2, %v846_v0 }

</bundles_post_ra>
